<compile_context>
chip_gen: v6e
topology: v6e:2x2x1
jax: 0.10.0
libtpu: 0.0.40
codegen_flags: <defaults>
</compile_context>

<pallas_src>
import functools

import jax
import jax.numpy as jnp
from jax.experimental import pallas as pl
from jax.experimental.pallas import tpu as pltpu

# Model sizes from the PyTorch module
HIDDEN_SIZE = 256
HIDDEN_SIZE2 = 64
WINDOW_SIZE = 50
INPUT_SIZE = WINDOW_SIZE
OUTPUT_SIZE = 1

# Lane-/sublane-aligned padded dims used inside the kernel
D_IN_PAD = 128    # 50  -> 128 (lane-dense x; extra rows of W1 are zero)
H1 = 256          # already aligned
H2_PAD = 128      # 64  -> 128 (extra cols of W5 / rows of W6 are zero)
D_OUT_PAD = 128   # 1   -> 128 (lane-dense output store; wrapper slices [:, :1])

MAX_TILE_M = 512  # batch rows per grid step (multiple of 16 for bf16 sublane packing)


def _round_up(x, m):
    return (x + m - 1) // m * m


def mlp_kernel(x_ref,
               w1, b1, w2, b2, w3, b3, w4, b4, w5, b5, w6, b6,
               o_ref):
    """One batch tile: 5x (bf16 matmul -> f32 acc -> bias -> ReLU) + final matmul + bias."""

    def layer(h_bf16, w_ref, b_ref, relu=True):
        y = jnp.dot(h_bf16, w_ref[...], preferred_element_type=jnp.float32) + b_ref[...]
        if relu:
            y = jnp.maximum(y, 0.0)
        return y

    h = layer(x_ref[...], w1, b1).astype(jnp.bfloat16)   # (TM, 256)
    h = layer(h, w2, b2).astype(jnp.bfloat16)            # (TM, 256)
    h = layer(h, w3, b3).astype(jnp.bfloat16)            # (TM, 256)
    h = layer(h, w4, b4).astype(jnp.bfloat16)            # (TM, 256)
    h = layer(h, w5, b5).astype(jnp.bfloat16)            # (TM, 128) (cols 64.. are zero)
    out = layer(h, w6, b6, relu=False)                    # (TM, 128) (cols 1..  are zero)
    o_ref[...] = out.astype(o_ref.dtype)


@functools.partial(jax.jit, static_argnames=("tile_m",))
def _mlp_forward_padded(x_pad, params_padded, *, tile_m):
    """x_pad: (B_pad, D_IN_PAD) bf16 with B_pad a multiple of tile_m. Returns (B_pad, 128) f32."""
    B_pad, _ = x_pad.shape
    grid = (B_pad // tile_m,)

    flat_args = [x_pad]
    in_specs = [pl.BlockSpec((tile_m, D_IN_PAD), lambda i: (i, 0))]
    for (w, b) in params_padded:
        flat_args += [w, b]
        # Constant block index -> weights/biases DMA'd once, stay resident in VMEM.
        in_specs.append(pl.BlockSpec(w.shape, lambda i: (0, 0)))
        in_specs.append(pl.BlockSpec(b.shape, lambda i: (0, 0)))

    return pl.pallas_call(
        mlp_kernel,
        out_shape=jax.ShapeDtypeStruct((B_pad, D_OUT_PAD), jnp.float32),
        grid=grid,
        in_specs=in_specs,
        out_specs=pl.BlockSpec((tile_m, D_OUT_PAD), lambda i: (i, 0)),
        compiler_params=pltpu.CompilerParams(
            dimension_semantics=("parallel",),     # shard batch tiles across TCs (v7x)
            vmem_limit_bytes=64 << 20,
        ),
    )(*flat_args)


def mlp_forward(x, params_padded, tile_m=MAX_TILE_M):
    """x: (B, INPUT_SIZE) float32; params_padded from pad_params(). Returns (B, 1) f32."""
    B = x.shape[0]
    tile = min(tile_m, _round_up(B, 16))          # bf16 packs 16 rows per sublane tile
    B_pad = _round_up(B, tile)
    x_pad = jnp.zeros((B_pad, D_IN_PAD), jnp.float32)
    x_pad = x_pad.at[:B, :INPUT_SIZE].set(x).astype(jnp.bfloat16)
    out_pad = _mlp_forward_padded(x_pad, params_padded, tile_m=tile)
    return out_pad[:B, :OUTPUT_SIZE]


def init_params(key):
    """PyTorch nn.Linear-style init (uniform +-1/sqrt(fan_in)), weights in (in, out) layout."""
    layer_dims = [
        (INPUT_SIZE, HIDDEN_SIZE),
        (HIDDEN_SIZE, HIDDEN_SIZE),
        (HIDDEN_SIZE, HIDDEN_SIZE),
        (HIDDEN_SIZE, HIDDEN_SIZE),
        (HIDDEN_SIZE, HIDDEN_SIZE2),
        (HIDDEN_SIZE2, OUTPUT_SIZE),
    ]
    params = []
    for (fan_in, fan_out) in layer_dims:
        key, kw, kb = jax.random.split(key, 3)
        bound = 1.0 / jnp.sqrt(jnp.float32(fan_in))
        w = jax.random.uniform(kw, (fan_in, fan_out), jnp.float32, -bound, bound)
        b = jax.random.uniform(kb, (fan_out,), jnp.float32, -bound, bound)
        params.append((w, b))
    return params


def pad_params(params):
    """Zero-pad to lane-aligned shapes; weights -> bf16 (MXU-native), biases stay f32 (1, N)."""
    padded_dims = [
        (D_IN_PAD, H1),
        (H1, H1),
        (H1, H1),
        (H1, H1),
        (H1, H2_PAD),
        (H2_PAD, D_OUT_PAD),
    ]
    out = []
    for (w, b), (pin, pout) in zip(params, padded_dims):
        wp = jnp.zeros((pin, pout), jnp.float32).at[: w.shape[0], : w.shape[1]].set(w)
        bp = jnp.zeros((1, pout), jnp.float32).at[0, : b.shape[0]].set(b)
        out.append((wp.astype(jnp.bfloat16), bp))
    return out


def mlp_reference_bf16(x, params_padded):
    """Pure-JAX reference mirroring the kernel math (bf16 operands, f32 accumulation)."""
    B = x.shape[0]
    h = jnp.zeros((B, D_IN_PAD), jnp.float32).at[:, :INPUT_SIZE].set(x).astype(jnp.bfloat16)
    n = len(params_padded)
    y = None
    for i, (w, b) in enumerate(params_padded):
        y = jnp.dot(h, w, preferred_element_type=jnp.float32) + b
        if i < n - 1:
            h = jnp.maximum(y, 0.0).astype(jnp.bfloat16)
    return y[:, :OUTPUT_SIZE]


def mlp_reference_f32(x, params):
    """Full-precision reference (original module semantics)."""
    h = x
    for i, (w, b) in enumerate(params):
        h = h @ w + b
        if i < len(params) - 1:
            h = jnp.maximum(h, 0.0)
    return h


if __name__ == "__main__":
    key = jax.random.PRNGKey(0)
    key, kx = jax.random.split(key)

    B = 8  # small batch self-test; any B works (padded to a multiple of the batch tile)
    x = jax.random.normal(kx, (B, INPUT_SIZE), jnp.float32)
    params = init_params(key)
    params_padded = pad_params(params)

    out = mlp_forward(x, params_padded)
    out = jax.block_until_ready(out)

    assert out.shape == (B, OUTPUT_SIZE), out.shape

    ref_bf = mlp_reference_bf16(x, params_padded)
    assert jnp.allclose(out, ref_bf, atol=5e-3, rtol=5e-3), (
        f"bf16-matched max abs err {jnp.max(jnp.abs(out - ref_bf))}")

    ref_f32 = mlp_reference_f32(x, params)
    assert jnp.allclose(out, ref_f32, atol=1e-1, rtol=1e-1), (
        f"f32 max abs err {jnp.max(jnp.abs(out - ref_f32))}")

    print("KERNEL_OK")
</pallas_src>

<mosaic_0001>
module attributes {stable_mosaic.version = 11 : i64} {
  func.func @mlp_kernel(%arg0: i32, %arg1: memref<16x128xbf16, #tpu.memory_space<vmem>>, %arg2: memref<128x256xbf16, #tpu.memory_space<vmem>>, %arg3: memref<1x256xf32, #tpu.memory_space<vmem>>, %arg4: memref<256x256xbf16, #tpu.memory_space<vmem>>, %arg5: memref<1x256xf32, #tpu.memory_space<vmem>>, %arg6: memref<256x256xbf16, #tpu.memory_space<vmem>>, %arg7: memref<1x256xf32, #tpu.memory_space<vmem>>, %arg8: memref<256x256xbf16, #tpu.memory_space<vmem>>, %arg9: memref<1x256xf32, #tpu.memory_space<vmem>>, %arg10: memref<256x128xbf16, #tpu.memory_space<vmem>>, %arg11: memref<1x128xf32, #tpu.memory_space<vmem>>, %arg12: memref<128x128xbf16, #tpu.memory_space<vmem>>, %arg13: memref<1x128xf32, #tpu.memory_space<vmem>>, %arg14: memref<16x128xf32, #tpu.memory_space<vmem>>) attributes {dimension_semantics = [#tpu.dimension_semantics<parallel>], iteration_bounds = array<i64: 1>, scalar_prefetch = 0 : i64, scratch_operands = 0 : i64, tpu.core_type = #tpu.core_type<tc>, window_params = [{transform_indices = @transform_0, window_bounds = array<i64: 16, 128>}, {pipeline_mode = #tpu.pipeline_mode<synchronous>, transform_indices = @transform_1, window_bounds = array<i64: 128, 256>}, {pipeline_mode = #tpu.pipeline_mode<synchronous>, transform_indices = @transform_2, window_bounds = array<i64: 1, 256>}, {pipeline_mode = #tpu.pipeline_mode<synchronous>, transform_indices = @transform_3, window_bounds = array<i64: 256, 256>}, {pipeline_mode = #tpu.pipeline_mode<synchronous>, transform_indices = @transform_4, window_bounds = array<i64: 1, 256>}, {pipeline_mode = #tpu.pipeline_mode<synchronous>, transform_indices = @transform_5, window_bounds = array<i64: 256, 256>}, {pipeline_mode = #tpu.pipeline_mode<synchronous>, transform_indices = @transform_6, window_bounds = array<i64: 1, 256>}, {pipeline_mode = #tpu.pipeline_mode<synchronous>, transform_indices = @transform_7, window_bounds = array<i64: 256, 256>}, {pipeline_mode = #tpu.pipeline_mode<synchronous>, transform_indices = @transform_8, window_bounds = array<i64: 1, 256>}, {pipeline_mode = #tpu.pipeline_mode<synchronous>, transform_indices = @transform_9, window_bounds = array<i64: 256, 128>}, {pipeline_mode = #tpu.pipeline_mode<synchronous>, transform_indices = @transform_10, window_bounds = array<i64: 1, 128>}, {pipeline_mode = #tpu.pipeline_mode<synchronous>, transform_indices = @transform_11, window_bounds = array<i64: 128, 128>}, {pipeline_mode = #tpu.pipeline_mode<synchronous>, transform_indices = @transform_12, window_bounds = array<i64: 1, 128>}, {transform_indices = @transform_13, window_bounds = array<i64: 16, 128>}]} {
    %c0 = arith.constant 0 : index
    %c0_0 = arith.constant 0 : index
    %0 = vector.load %arg1[%c0, %c0_0] : memref<16x128xbf16, #tpu.memory_space<vmem>>, vector<16x128xbf16>
    %c0_1 = arith.constant 0 : index
    %c0_2 = arith.constant 0 : index
    %1 = vector.load %arg2[%c0_1, %c0_2] : memref<128x256xbf16, #tpu.memory_space<vmem>>, vector<128x256xbf16>
    %cst = arith.constant dense<0.000000e+00> : vector<16x256xf32>
    %2 = tpu.matmul %0, %1, %cst {dimension_numbers = #tpu.dot_dimension_numbers<[1], [0], [0], [1], [0, 0, 1, 1], [], []>} : vector<16x128xbf16>, vector<128x256xbf16>, vector<16x256xf32> -> vector<16x256xf32>
    %c0_3 = arith.constant 0 : index
    %c0_4 = arith.constant 0 : index
    %3 = vector.load %arg3[%c0_3, %c0_4] : memref<1x256xf32, #tpu.memory_space<vmem>>, vector<1x256xf32>
    %4 = vector.broadcast %3 : vector<1x256xf32> to vector<16x256xf32>
    %5 = arith.addf %2, %4 : vector<16x256xf32>
    %cst_5 = arith.constant 0.000000e+00 : f32
    %6 = vector.broadcast %cst_5 : f32 to vector<16x256xf32>
    %7 = arith.maximumf %5, %6 : vector<16x256xf32>
    %8 = arith.truncf %7 : vector<16x256xf32> to vector<16x256xbf16>
    %c0_6 = arith.constant 0 : index
    %c0_7 = arith.constant 0 : index
    %9 = vector.load %arg4[%c0_6, %c0_7] : memref<256x256xbf16, #tpu.memory_space<vmem>>, vector<256x256xbf16>
    %cst_8 = arith.constant dense<0.000000e+00> : vector<16x256xf32>
    %10 = tpu.matmul %8, %9, %cst_8 {dimension_numbers = #tpu.dot_dimension_numbers<[1], [0], [0], [1], [0, 0, 1, 1], [], []>} : vector<16x256xbf16>, vector<256x256xbf16>, vector<16x256xf32> -> vector<16x256xf32>
    %c0_9 = arith.constant 0 : index
    %c0_10 = arith.constant 0 : index
    %11 = vector.load %arg5[%c0_9, %c0_10] : memref<1x256xf32, #tpu.memory_space<vmem>>, vector<1x256xf32>
    %12 = vector.broadcast %11 : vector<1x256xf32> to vector<16x256xf32>
    %13 = arith.addf %10, %12 : vector<16x256xf32>
    %cst_11 = arith.constant 0.000000e+00 : f32
    %14 = vector.broadcast %cst_11 : f32 to vector<16x256xf32>
    %15 = arith.maximumf %13, %14 : vector<16x256xf32>
    %16 = arith.truncf %15 : vector<16x256xf32> to vector<16x256xbf16>
    %c0_12 = arith.constant 0 : index
    %c0_13 = arith.constant 0 : index
    %17 = vector.load %arg6[%c0_12, %c0_13] : memref<256x256xbf16, #tpu.memory_space<vmem>>, vector<256x256xbf16>
    %cst_14 = arith.constant dense<0.000000e+00> : vector<16x256xf32>
    %18 = tpu.matmul %16, %17, %cst_14 {dimension_numbers = #tpu.dot_dimension_numbers<[1], [0], [0], [1], [0, 0, 1, 1], [], []>} : vector<16x256xbf16>, vector<256x256xbf16>, vector<16x256xf32> -> vector<16x256xf32>
    %c0_15 = arith.constant 0 : index
    %c0_16 = arith.constant 0 : index
    %19 = vector.load %arg7[%c0_15, %c0_16] : memref<1x256xf32, #tpu.memory_space<vmem>>, vector<1x256xf32>
    %20 = vector.broadcast %19 : vector<1x256xf32> to vector<16x256xf32>
    %21 = arith.addf %18, %20 : vector<16x256xf32>
    %cst_17 = arith.constant 0.000000e+00 : f32
    %22 = vector.broadcast %cst_17 : f32 to vector<16x256xf32>
    %23 = arith.maximumf %21, %22 : vector<16x256xf32>
    %24 = arith.truncf %23 : vector<16x256xf32> to vector<16x256xbf16>
    %c0_18 = arith.constant 0 : index
    %c0_19 = arith.constant 0 : index
    %25 = vector.load %arg8[%c0_18, %c0_19] : memref<256x256xbf16, #tpu.memory_space<vmem>>, vector<256x256xbf16>
    %cst_20 = arith.constant dense<0.000000e+00> : vector<16x256xf32>
    %26 = tpu.matmul %24, %25, %cst_20 {dimension_numbers = #tpu.dot_dimension_numbers<[1], [0], [0], [1], [0, 0, 1, 1], [], []>} : vector<16x256xbf16>, vector<256x256xbf16>, vector<16x256xf32> -> vector<16x256xf32>
    %c0_21 = arith.constant 0 : index
    %c0_22 = arith.constant 0 : index
    %27 = vector.load %arg9[%c0_21, %c0_22] : memref<1x256xf32, #tpu.memory_space<vmem>>, vector<1x256xf32>
    %28 = vector.broadcast %27 : vector<1x256xf32> to vector<16x256xf32>
    %29 = arith.addf %26, %28 : vector<16x256xf32>
    %cst_23 = arith.constant 0.000000e+00 : f32
    %30 = vector.broadcast %cst_23 : f32 to vector<16x256xf32>
    %31 = arith.maximumf %29, %30 : vector<16x256xf32>
    %32 = arith.truncf %31 : vector<16x256xf32> to vector<16x256xbf16>
    %c0_24 = arith.constant 0 : index
    %c0_25 = arith.constant 0 : index
    %33 = vector.load %arg10[%c0_24, %c0_25] : memref<256x128xbf16, #tpu.memory_space<vmem>>, vector<256x128xbf16>
    %cst_26 = arith.constant dense<0.000000e+00> : vector<16x128xf32>
    %34 = tpu.matmul %32, %33, %cst_26 {dimension_numbers = #tpu.dot_dimension_numbers<[1], [0], [0], [1], [0, 0, 1, 1], [], []>} : vector<16x256xbf16>, vector<256x128xbf16>, vector<16x128xf32> -> vector<16x128xf32>
    %c0_27 = arith.constant 0 : index
    %c0_28 = arith.constant 0 : index
    %35 = vector.load %arg11[%c0_27, %c0_28] : memref<1x128xf32, #tpu.memory_space<vmem>>, vector<1x128xf32>
    %36 = vector.broadcast %35 : vector<1x128xf32> to vector<16x128xf32>
    %37 = arith.addf %34, %36 : vector<16x128xf32>
    %cst_29 = arith.constant 0.000000e+00 : f32
    %38 = vector.broadcast %cst_29 : f32 to vector<16x128xf32>
    %39 = arith.maximumf %37, %38 : vector<16x128xf32>
    %40 = arith.truncf %39 : vector<16x128xf32> to vector<16x128xbf16>
    %c0_30 = arith.constant 0 : index
    %c0_31 = arith.constant 0 : index
    %41 = vector.load %arg12[%c0_30, %c0_31] : memref<128x128xbf16, #tpu.memory_space<vmem>>, vector<128x128xbf16>
    %cst_32 = arith.constant dense<0.000000e+00> : vector<16x128xf32>
    %42 = tpu.matmul %40, %41, %cst_32 {dimension_numbers = #tpu.dot_dimension_numbers<[1], [0], [0], [1], [0, 0, 1, 1], [], []>} : vector<16x128xbf16>, vector<128x128xbf16>, vector<16x128xf32> -> vector<16x128xf32>
    %c0_33 = arith.constant 0 : index
    %c0_34 = arith.constant 0 : index
    %43 = vector.load %arg13[%c0_33, %c0_34] : memref<1x128xf32, #tpu.memory_space<vmem>>, vector<1x128xf32>
    %44 = vector.broadcast %43 : vector<1x128xf32> to vector<16x128xf32>
    %45 = arith.addf %42, %44 : vector<16x128xf32>
    %c0_35 = arith.constant 0 : index
    %c0_36 = arith.constant 0 : index
    %46 = vector.load %arg14[%c0_35, %c0_36] : memref<16x128xf32, #tpu.memory_space<vmem>>, vector<16x128xf32>
    tpu.vector_store %arg14[%c0_35, %c0_36], %45 {strides = array<i32>} : memref<16x128xf32, #tpu.memory_space<vmem>>, vector<16x128xf32>,
    return
  }
  func.func @transform_0(%arg0: i32) -> (i32, i32) {
    %c0_i32 = arith.constant 0 : i32
    %c0_i32_0 = arith.constant 0 : i32
    return %arg0, %c0_i32 : i32, i32
  }
  func.func @transform_1(%arg0: i32) -> (i32, i32) {
    %c0_i32 = arith.constant 0 : i32
    %c0_i32_0 = arith.constant 0 : i32
    %c0_i32_1 = arith.constant 0 : i32
    return %c0_i32, %c0_i32_0 : i32, i32
  }
  func.func @transform_2(%arg0: i32) -> (i32, i32) {
    %c0_i32 = arith.constant 0 : i32
    %c0_i32_0 = arith.constant 0 : i32
    %c0_i32_1 = arith.constant 0 : i32
    return %c0_i32, %c0_i32_0 : i32, i32
  }
  func.func @transform_3(%arg0: i32) -> (i32, i32) {
    %c0_i32 = arith.constant 0 : i32
    %c0_i32_0 = arith.constant 0 : i32
    %c0_i32_1 = arith.constant 0 : i32
    return %c0_i32, %c0_i32_0 : i32, i32
  }
  func.func @transform_4(%arg0: i32) -> (i32, i32) {
    %c0_i32 = arith.constant 0 : i32
    %c0_i32_0 = arith.constant 0 : i32
    %c0_i32_1 = arith.constant 0 : i32
    return %c0_i32, %c0_i32_0 : i32, i32
  }
  func.func @transform_5(%arg0: i32) -> (i32, i32) {
    %c0_i32 = arith.constant 0 : i32
    %c0_i32_0 = arith.constant 0 : i32
    %c0_i32_1 = arith.constant 0 : i32
    return %c0_i32, %c0_i32_0 : i32, i32
  }
  func.func @transform_6(%arg0: i32) -> (i32, i32) {
    %c0_i32 = arith.constant 0 : i32
    %c0_i32_0 = arith.constant 0 : i32
    %c0_i32_1 = arith.constant 0 : i32
    return %c0_i32, %c0_i32_0 : i32, i32
  }
  func.func @transform_7(%arg0: i32) -> (i32, i32) {
    %c0_i32 = arith.constant 0 : i32
    %c0_i32_0 = arith.constant 0 : i32
    %c0_i32_1 = arith.constant 0 : i32
    return %c0_i32, %c0_i32_0 : i32, i32
  }
  func.func @transform_8(%arg0: i32) -> (i32, i32) {
    %c0_i32 = arith.constant 0 : i32
    %c0_i32_0 = arith.constant 0 : i32
    %c0_i32_1 = arith.constant 0 : i32
    return %c0_i32, %c0_i32_0 : i32, i32
  }
  func.func @transform_9(%arg0: i32) -> (i32, i32) {
    %c0_i32 = arith.constant 0 : i32
    %c0_i32_0 = arith.constant 0 : i32
    %c0_i32_1 = arith.constant 0 : i32
    return %c0_i32, %c0_i32_0 : i32, i32
  }
  func.func @transform_10(%arg0: i32) -> (i32, i32) {
    %c0_i32 = arith.constant 0 : i32
    %c0_i32_0 = arith.constant 0 : i32
    %c0_i32_1 = arith.constant 0 : i32
    return %c0_i32, %c0_i32_0 : i32, i32
  }
  func.func @transform_11(%arg0: i32) -> (i32, i32) {
    %c0_i32 = arith.constant 0 : i32
    %c0_i32_0 = arith.constant 0 : i32
    %c0_i32_1 = arith.constant 0 : i32
    return %c0_i32, %c0_i32_0 : i32, i32
  }
  func.func @transform_12(%arg0: i32) -> (i32, i32) {
    %c0_i32 = arith.constant 0 : i32
    %c0_i32_0 = arith.constant 0 : i32
    %c0_i32_1 = arith.constant 0 : i32
    return %c0_i32, %c0_i32_0 : i32, i32
  }
  func.func @transform_13(%arg0: i32) -> (i32, i32) {
    %c0_i32 = arith.constant 0 : i32
    %c0_i32_0 = arith.constant 0 : i32
    return %arg0, %c0_i32 : i32, i32
  }
}

</mosaic_0001>

<bundles_post_ra>
// kernel: _mlp_forward_padded.1
= control target key start
LH: loop header
LB: loop body
LE: loop exit
PB: predicated region body
PF: predicated region fallthrough
CT: control target
= control target key end

     0   :  { %18 = vsyncpa [#allocation3], 0  ;;  %s2109_s0 = inlined_call_operand.hbm [shape: bf16[16,128], index: 0, kind: input, shape index: {}]   ;;  %s2110_s1 = inlined_call_operand.hbm [shape: bf16[128,256], index: 1, kind: input, shape index: {}]   ;;  %s2111_s2 = inlined_call_operand.vmem [shape: f32[1,256], index: 2, kind: input, shape index: {}]   ;;  %s2112_s3 = inlined_call_operand.hbm [shape: bf16[256,256], index: 3, kind: input, shape index: {}]   ;;  %s2113_s4 = inlined_call_operand.vmem [shape: f32[1,256], index: 4, kind: input, shape index: {}]   ;;  %s2114_s5 = inlined_call_operand.hbm [shape: bf16[256,256], index: 5, kind: input, shape index: {}]   ;;  %s2115_s6 = inlined_call_operand.vmem [shape: f32[1,256], index: 6, kind: input, shape index: {}]   ;;  %s2116_s7 = inlined_call_operand.hbm [shape: bf16[256,256], index: 7, kind: input, shape index: {}]   ;;  %s2117_s8 = inlined_call_operand.vmem [shape: f32[1,256], index: 8, kind: input, shape index: {}]   ;;  %s2118_s9 = inlined_call_operand.hbm [shape: bf16[256,128], index: 9, kind: input, shape index: {}]   ;;  %s2119_s10 = inlined_call_operand.vmem [shape: f32[1,128], index: 10, kind: input, shape index: {}]   ;;  %s2120_s11 = inlined_call_operand.hbm [shape: bf16[128,128], index: 11, kind: input, shape index: {}]   ;;  %s2121_s12 = inlined_call_operand.vmem [shape: f32[1,128], index: 12, kind: input, shape index: {}]   ;;  %s2122_s13 = inlined_call_operand.hbm [shape: f32[16,128], index: 13, kind: output, shape index: {}]  }
   0x1   :  { %19 = vsyncpa [#allocation6], 0 }
   0x2   :  { %20 = vsyncpa [#allocation9], 0 }
   0x3   :  { %21 = vsyncpa [#allocation12], 0 }
   0x4   :  { %22 = vsyncpa [#allocation4], 0  ;;  %s1946_s25 = smov [#allocation5]  }
   0x5   :  { %s40_s26 = sshll.u32 %s1946_s25, 4  ;;  %s41_s26 = int_to_ptr.vmem [resolvable:$true] %s40_s26 }
   0x6   :  { %s1784_s27 = scalar_lea.vmem %s41_s26, 2048  ;;  %p1789_p1 = scmp.lt.s32.totalorder %s41_s26, %s41_s26 }
   0x7   :  { %p1785_p0 = scmp.ne.s32.totalorder %s41_s26, %s1784_s27  ;;  %p1790_p2 = scmp.lt.s32.totalorder %s1784_s27, %s1784_s27 }
   0x9   :  { %p1791_p3 = por %p1790_p2, %p1789_p1 }
   0xb   :  { %p1792_p4 = pnand %p1791_p3, %p1785_p0 }
   0xd   :  { %1795 = shalt.err (!%p1792_p4)
}
   0xe   :  { %s1947_s28 = smov 128   ;;  %s1948_s29 = smov 8  }
   0xf   :  { %46 = dma.hbm_to_vmem [thread:$0]  %s2110_s1, 2048, %s41_s26, [#allocation6], %s1947_s28, %s1947_s28, %s1948_s29  }
  0x10   :  { %s1949_s15 = smov [#allocation8]  }
  0x11   :  { %s68_s16 = sshll.u32 %s1949_s15, 4  ;;  %s69_s16 = int_to_ptr.vmem [resolvable:$true] %s68_s16 }
  0x12   :  { %s1804_s17 = scalar_lea.vmem %s69_s16, 4096  ;;  %p1809_p6 = scmp.lt.s32.totalorder %s69_s16, %s69_s16 }
  0x13   :  { %p1805_p5 = scmp.ne.s32.totalorder %s69_s16, %s1804_s17  ;;  %p1810_p7 = scmp.lt.s32.totalorder %s1804_s17, %s1804_s17 }
  0x15   :  { %p1811_p8 = por %p1810_p7, %p1809_p6 }
  0x17   :  { %p1812_p9 = pnand %p1811_p8, %p1805_p5 }
  0x19   :  { %1815 = shalt.err (!%p1812_p9)
}
  0x1a   :  { %74 = dma.hbm_to_vmem [thread:$0]  %s2114_s5, 4096, %s69_s16, [#allocation9], %s1947_s28, %s1947_s28, %s1948_s29  }
  0x1b   :  { %s1950_s20 = smov [#allocation11]   ;;  %s1951_s1 = smov [#allocation2]  }
  0x1c   :  { %s96_s21 = sshll.u32 %s1950_s20, 4  ;;  %s28_s22 = sshll.u32 %s1951_s1, 4  ;;  %s97_s21 = int_to_ptr.vmem [resolvable:$true] %s96_s21  ;;  %s29_s22 = int_to_ptr.vmem [resolvable:$true] %s28_s22 }
  0x1d   :  { %s1824_s23 = scalar_lea.vmem %s97_s21, 2048  ;;  %p1829_p11 = scmp.lt.s32.totalorder %s97_s21, %s97_s21 }
  0x1e   :  { %p1825_p10 = scmp.ne.s32.totalorder %s97_s21, %s1824_s23  ;;  %p1830_p12 = scmp.lt.s32.totalorder %s1824_s23, %s1824_s23 }
  0x20   :  { %p1831_p13 = por %p1830_p12, %p1829_p11 }
  0x22   :  { %p1832_p0 = pnand %p1831_p13, %p1825_p10 }
  0x24   :  { %1835 = shalt.err (!%p1832_p0)
}
  0x25   :  { %s1952_s24 = smov 64   ;;  %s1953_s25 = smov 4  }
  0x26   :  { %102 = dma.hbm_to_vmem [thread:$0]  %s2118_s9, 2048, %s97_s21, [#allocation12], %s1952_s24, %s1952_s24, %s1953_s25  }
  0x27   :  { %s1844_s27 = scalar_lea.vmem %s29_s22, 128  ;;  %p1849_p2 = scmp.lt.s32.totalorder %s29_s22, %s29_s22 }
  0x28   :  { %p1845_p1 = scmp.ne.s32.totalorder %s29_s22, %s1844_s27  ;;  %p1850_p3 = scmp.lt.s32.totalorder %s1844_s27, %s1844_s27 }
  0x2a   :  { %p1851_p4 = por %p1850_p3, %p1849_p2 }
  0x2c   :  { %p1852_p5 = pnand %p1851_p4, %p1845_p1 }
  0x2e   :  { %1855 = shalt.err (!%p1852_p5)
}
  0x2f   :  { %34 = dma.hbm_to_vmem [thread:$0]  %s2109_s0, 128, %s29_s22, [#allocation3], %s1952_s24, %s1952_s24, %s1953_s25  }
  0x30   :  { %s1954_s15 = smov [#allocation7]   ;;  %s1955_s17 = smov [#allocation10]  }
  0x31   :  { %s54_s16 = sshll.u32 %s1954_s15, 4  ;;  %s82_s18 = sshll.u32 %s1955_s17, 4  ;;  %s55_s16 = int_to_ptr.vmem [resolvable:$true] %s54_s16  ;;  %s83_s18 = int_to_ptr.vmem [resolvable:$true] %s82_s18 }
  0x32   :  { %s1864_s9 = scalar_lea.vmem %s55_s16, 4096  ;;  %p1869_p7 = scmp.lt.s32.totalorder %s55_s16, %s55_s16 }
  0x33   :  { %p1865_p6 = scmp.ne.s32.totalorder %s55_s16, %s1864_s9  ;;  %p1870_p8 = scmp.lt.s32.totalorder %s1864_s9, %s1864_s9 }
  0x35   :  { %p1871_p9 = por %p1870_p8, %p1869_p7 }
  0x37   :  { %p1872_p10 = pnand %p1871_p9, %p1865_p6 }
  0x39   :  { %1875 = shalt.err (!%p1872_p10)
}
  0x3a   :  { %60 = dma.hbm_to_vmem [thread:$0]  %s2112_s3, 4096, %s55_s16, [#allocation6], %s1947_s28, %s1947_s28, %s1948_s29  }
  0x3b   :  { %s1884_s0 = scalar_lea.vmem %s83_s18, 4096  ;;  %p1889_p12 = scmp.lt.s32.totalorder %s83_s18, %s83_s18 }
  0x3c   :  { %p1885_p11 = scmp.ne.s32.totalorder %s83_s18, %s1884_s0  ;;  %p1890_p13 = scmp.lt.s32.totalorder %s1884_s0, %s1884_s0 }
  0x3e   :  { %p1891_p0 = por %p1890_p13, %p1889_p12 }
  0x40   :  { %p1892_p1 = pnand %p1891_p0, %p1885_p11 }
  0x42   :  { %1895 = shalt.err (!%p1892_p1)
}
  0x43   :  { %88 = dma.hbm_to_vmem [thread:$0]  %s2116_s7, 4096, %s83_s18, [#allocation9], %s1947_s28, %s1947_s28, %s1948_s29  }
  0x44   :  { %s1956_s22 = smov [#allocation13]  }
  0x45   :  { %s110_s23 = sshll.u32 %s1956_s22, 4  ;;  %s111_s23 = int_to_ptr.vmem [resolvable:$true] %s110_s23 }
  0x46   :  { %s1904_s26 = scalar_lea.vmem %s111_s23, 1024  ;;  %p1909_p3 = scmp.lt.s32.totalorder %s111_s23, %s111_s23 }
  0x47   :  { %p1905_p2 = scmp.ne.s32.totalorder %s111_s23, %s1904_s26  ;;  %p1910_p4 = scmp.lt.s32.totalorder %s1904_s26, %s1904_s26 }
  0x49   :  { %p1911_p5 = por %p1910_p4, %p1909_p3 }
  0x4b   :  { %p1912_p6 = pnand %p1911_p5, %p1905_p2 }
  0x4d   :  { %1915 = shalt.err (!%p1912_p6)
}
  0x4e   :  { %116 = dma.hbm_to_vmem [thread:$0]  %s2120_s11, 1024, %s111_s23, [#allocation12], %s1952_s24, %s1952_s24, %s1953_s25  }
  0x4f   :  { %1936 = dma.done.wait [#allocation3], 128  }
  0x50   :  { %1937 = vsyncadd [#allocation3], 4294967168 }
  0x51   :  { %1938 = dma.done.wait [#allocation6], 6144  }
  0x52   :  { %1939 = vsyncadd [#allocation6], 4294961152 }
  0x53   :  { %1940 = dma.done.wait [#allocation9], 8192  }
  0x54   :  { %1941 = vsyncadd [#allocation9], 4294959104 }
  0x55   :  { %1942 = dma.done.wait [#allocation12], 3072  }
  0x56   :  { %1943 = vsyncadd [#allocation12], 4294964224  ;;  %v1957_v0 = vmov 0   ;;  %v1583_v1 = vld [vmem:[#allocation5 + $0x74] ss:$8 sps:$4 sm:$0xff]   ;;  %vm1959_vm0 = vmmov 0  }
  0x57   :  { %289 = vmatprep.mubr.bf16.mxu0 %v1957_v0  ;;  %v1585_v2 = vld [vmem:[#allocation5 + $0x70] ss:$8 sps:$4 sm:$0xff]   ;;  %257 = vmatprep.subr.bf16.mxu0 %v1583_v1  ;;  %v1586_v3 = vld [vmem:[#allocation5 + $0x64] ss:$8 sps:$4 sm:$0xff]   ;;  %v1588_v4 = vld [vmem:[#allocation5 + $0x60] ss:$8 sps:$4 sm:$0xff]  }
  0x58   :  { %258 = vmatpush1.bf16.msra.mxu0 %v1585_v2  ;;  %v1589_v5 = vld [vmem:[#allocation5 + $0x54] ss:$8 sps:$4 sm:$0xff]   ;;  %v1591_v6 = vld [vmem:[#allocation5 + $0x50] ss:$8 sps:$4 sm:$0xff]   ;;  %v1592_v7 = vld [vmem:[#allocation5 + $0x44] ss:$8 sps:$4 sm:$0xff]  }
  0x59   :  { %259 = vmatprep.subr.bf16.mxu0 %v1586_v3  ;;  %v1594_v8 = vld [vmem:[#allocation5 + $0x40] ss:$8 sps:$4 sm:$0xff]   ;;  %v1595_v9 = vld [vmem:[#allocation5 + $0x34] ss:$8 sps:$4 sm:$0xff]   ;;  %v1610_v11 = vld [vmem:[#allocation7 + $0x70] ss:$8 sps:$4 sm:$0xff]  }
  0x5a   :  { %v1608_v10 = vld [vmem:[#allocation7 + $0x74] ss:$8 sps:$4 sm:$0xff]   ;;  %v1611_v12 = vld [vmem:[#allocation7 + $0x64] ss:$8 sps:$4 sm:$0xff]   ;;  %v1597_v13 = vld [vmem:[#allocation5 + $0x30] ss:$8 sps:$4 sm:$0xff]  }
  0x5b   :  { %510 = vmatprep.subr.bf16.mxu1 %v1608_v10  ;;  %v1613_v14 = vld [vmem:[#allocation7 + $0x60] ss:$8 sps:$4 sm:$0xff]   ;;  %v1598_v15 = vld [vmem:[#allocation5 + $0x24] ss:$8 sps:$4 sm:$0xff]   ;;  %v1614_v16 = vld [vmem:[#allocation7 + $0x54] ss:$8 sps:$4 sm:$0xff]  }
  0x5c   :  { %260 = vmatpush1.bf16.msra.mxu0 %v1588_v4  ;;  %511 = vmatpush1.bf16.msra.mxu1 %v1610_v11  ;;  %v1600_v17 = vld [vmem:[#allocation5 + $0x20] ss:$8 sps:$4 sm:$0xff]   ;;  %v1616_v18 = vld [vmem:[#allocation7 + $0x50] ss:$8 sps:$4 sm:$0xff]   ;;  %v1601_v19 = vld [vmem:[#allocation5 + $0x14] ss:$8 sps:$4 sm:$0xff]  }
  0x5d   :  { %261 = vmatprep.subr.bf16.mxu0 %v1589_v5  ;;  %512 = vmatprep.subr.bf16.mxu1 %v1611_v12  ;;  %v1617_v20 = vld [vmem:[#allocation7 + $0x44] ss:$8 sps:$4 sm:$0xff]   ;;  %v1603_v21 = vld [vmem:[#allocation5 + $0x10] ss:$8 sps:$4 sm:$0xff]   ;;  %v1619_v22 = vld [vmem:[#allocation7 + $0x40] ss:$8 sps:$4 sm:$0xff]   ;;  %v161_v12 = vlaneseq }
  0x5e   :  { %v1604_v23 = vld [vmem:[#allocation5 + $0x4] ss:$8 sps:$4 sm:$0xff]   ;;  %v1620_v24 = vld [vmem:[#allocation7 + $0x34] ss:$8 sps:$4 sm:$0xff]   ;;  %v1606_v25 = vld [vmem:[#allocation5] ss:$8 sps:$4 sm:$0xff]  }
  0x5f   :  { %v1622_v26 = vld [vmem:[#allocation7 + $0x30] ss:$8 sps:$4 sm:$0xff]   ;;  %v1623_v28 = vld [vmem:[#allocation7 + $0x24] ss:$8 sps:$4 sm:$0xff]   ;;  %v1625_v29 = vld [vmem:[#allocation7 + $0x20] ss:$8 sps:$4 sm:$0xff]  }
  0x60   :  { %262 = vmatpush1.bf16.msra.mxu0 %v1591_v6  ;;  %513 = vmatpush1.bf16.msra.mxu1 %v1613_v14  ;;  %v1607_v27 = vld [vmem:[#allocation2] sm:$0xff]   ;;  %v1629_v32 = vld [vmem:[#allocation7 + $0x4] ss:$8 sps:$4 sm:$0xff]   ;;  %v1631_v33 = vld [vmem:[#allocation7] ss:$8 sps:$4 sm:$0xff]   ;;  %s1960_s16 = smov [#allocation14]  }
  0x61   :  { %263 = vmatprep.subr.bf16.mxu0 %v1592_v7  ;;  %514 = vmatprep.subr.bf16.mxu1 %v1614_v16  ;;  %v1626_v30 = vld [vmem:[#allocation7 + $0x14] ss:$8 sps:$4 sm:$0xff]   ;;  %v1628_v31 = vld [vmem:[#allocation7 + $0x10] ss:$8 sps:$4 sm:$0xff]   ;;  %v1635_v36 = vld [vmem:[#allocation7 + $0xe4] ss:$8 sps:$4 sm:$0xff]  }
  0x62   :  { %v1632_v34 = vld [vmem:[#allocation7 + $0xf4] ss:$8 sps:$4 sm:$0xff]   ;;  %v1634_v35 = vld [vmem:[#allocation7 + $0xf0] ss:$8 sps:$4 sm:$0xff]   ;;  %v1637_v37 = vld [vmem:[#allocation7 + $0xe0] ss:$8 sps:$4 sm:$0xff]  }
  0x63   :  { %v1638_v38 = vld [vmem:[#allocation7 + $0xd4] ss:$8 sps:$4 sm:$0xff]   ;;  %v1640_v39 = vld [vmem:[#allocation7 + $0xd0] ss:$8 sps:$4 sm:$0xff]   ;;  %v1641_v40 = vld [vmem:[#allocation7 + $0xc4] ss:$8 sps:$4 sm:$0xff]  }
  0x64   :  { %264 = vmatpush1.bf16.msra.mxu0 %v1594_v8  ;;  %515 = vmatpush1.bf16.msra.mxu1 %v1616_v18  ;;  %v1643_v41 = vld [vmem:[#allocation7 + $0xc0] ss:$8 sps:$4 sm:$0xff]   ;;  %v1644_v42 = vld [vmem:[#allocation7 + $0xb4] ss:$8 sps:$4 sm:$0xff]   ;;  %v1646_v43 = vld [vmem:[#allocation7 + $0xb0] ss:$8 sps:$4 sm:$0xff]  }
  0x65   :  { %265 = vmatprep.subr.bf16.mxu0 %v1595_v9  ;;  %516 = vmatprep.subr.bf16.mxu1 %v1617_v20  ;;  %v1647_v44 = vld [vmem:[#allocation7 + $0xa4] ss:$8 sps:$4 sm:$0xff]   ;;  %v1649_v45 = vld [vmem:[#allocation7 + $0xa0] ss:$8 sps:$4 sm:$0xff]   ;;  %v1650_v46 = vld [vmem:[#allocation7 + $0x94] ss:$8 sps:$4 sm:$0xff]  }
  0x66   :  { %v1652_v47 = vld [vmem:[#allocation7 + $0x90] ss:$8 sps:$4 sm:$0xff]   ;;  %v1653_v48 = vld [vmem:[#allocation7 + $0x84] ss:$8 sps:$4 sm:$0xff]   ;;  %v1655_v49 = vld [vmem:[#allocation7 + $0x80] ss:$8 sps:$4 sm:$0xff]  }
  0x67   :  { %v1656_v50 = vld [vmem:[#allocation8 + $0x70] ss:$8 sps:$4 sm:$0xff]   ;;  %v1658_v51 = vld [vmem:[#allocation8 + $0x74] ss:$8 sps:$4 sm:$0xff]   ;;  %v1661_v52 = vld [vmem:[#allocation8 + $0x64] ss:$8 sps:$4 sm:$0xff]  }
  0x68   :  { %266 = vmatpush1.bf16.msra.mxu0 %v1597_v13  ;;  %517 = vmatpush1.bf16.msra.mxu1 %v1619_v22  ;;  %v1659_v53 = vld [vmem:[#allocation8 + $0x60] ss:$8 sps:$4 sm:$0xff]   ;;  %v1664_v54 = vld [vmem:[#allocation8 + $0x54] ss:$8 sps:$4 sm:$0xff]   ;;  %v1662_v55 = vld [vmem:[#allocation8 + $0x50] ss:$8 sps:$4 sm:$0xff]  }
  0x69   :  { %267 = vmatprep.subr.bf16.mxu0 %v1598_v15  ;;  %518 = vmatprep.subr.bf16.mxu1 %v1620_v24  ;;  %v1667_v56 = vld [vmem:[#allocation8 + $0x44] ss:$8 sps:$4 sm:$0xff]   ;;  %v1665_v57 = vld [vmem:[#allocation8 + $0x40] ss:$8 sps:$4 sm:$0xff]   ;;  %v1670_v58 = vld [vmem:[#allocation8 + $0x34] ss:$8 sps:$4 sm:$0xff]  }
  0x6a   :  { %v1668_v59 = vld [vmem:[#allocation8 + $0x30] ss:$8 sps:$4 sm:$0xff]   ;;  %v1673_v60 = vld [vmem:[#allocation8 + $0x24] ss:$8 sps:$4 sm:$0xff]   ;;  %v1671_v61 = vld [vmem:[#allocation8 + $0x20] ss:$8 sps:$4 sm:$0xff]  }
  0x6b   :  { %v1676_v62 = vld [vmem:[#allocation8 + $0x14] ss:$8 sps:$4 sm:$0xff]   ;;  %v1674_v63 = vld [vmem:[#allocation8 + $0x10] ss:$8 sps:$4 sm:$0xff]   ;;  %v1679_v0 = vld [vmem:[#allocation8 + $0x4] ss:$8 sps:$4 sm:$0xff]  }
  0x6c   :  { %268 = vmatpush1.bf16.msra.mxu0 %v1600_v17  ;;  %519 = vmatpush1.bf16.msra.mxu1 %v1622_v26  ;;  %v1677_v1 = vld [vmem:[#allocation8] ss:$8 sps:$4 sm:$0xff]   ;;  %v1682_v2 = vld [vmem:[#allocation8 + $0xf4] ss:$8 sps:$4 sm:$0xff]   ;;  %v1680_v3 = vld [vmem:[#allocation8 + $0xf0] ss:$8 sps:$4 sm:$0xff]  }
  0x6d   :  { %269 = vmatprep.subr.bf16.mxu0 %v1601_v19  ;;  %520 = vmatprep.subr.bf16.mxu1 %v1623_v28  ;;  %v1685_v4 = vld [vmem:[#allocation8 + $0xe4] ss:$8 sps:$4 sm:$0xff]   ;;  %v1683_v5 = vld [vmem:[#allocation8 + $0xe0] ss:$8 sps:$4 sm:$0xff]   ;;  %v1688_v6 = vld [vmem:[#allocation8 + $0xd4] ss:$8 sps:$4 sm:$0xff]  }
  0x6e   :  { %v1686_v7 = vld [vmem:[#allocation8 + $0xd0] ss:$8 sps:$4 sm:$0xff]   ;;  %v1691_v8 = vld [vmem:[#allocation8 + $0xc4] ss:$8 sps:$4 sm:$0xff]   ;;  %v1689_v9 = vld [vmem:[#allocation8 + $0xc0] ss:$8 sps:$4 sm:$0xff]  }
  0x6f   :  { %v1694_v10 = vld [vmem:[#allocation8 + $0xb4] ss:$8 sps:$4 sm:$0xff]   ;;  %v1692_v11 = vld [vmem:[#allocation8 + $0xb0] ss:$8 sps:$4 sm:$0xff]   ;;  %v162_v13 = vshrl.u32 %v161_v12, 7  ;;  %s1363_s17 = sshll.u32 %s1960_s16, 4  ;;  %s1364_s17 = int_to_ptr.vmem [resolvable:$true] %s1363_s17 }
  0x70   :  { %270 = vmatpush1.bf16.msra.mxu0 %v1603_v21  ;;  %521 = vmatpush1.bf16.msra.mxu1 %v1625_v29  ;;  %v159_v16 = vld [vmem:[%s2111_s2] sm:$0x3]  ;;  %p1921_p8 = scmp.lt.s32.totalorder %s1364_s17, %s1364_s17 }
  0x71   :  { %271 = vmatprep.subr.bf16.mxu0 %v1604_v23  ;;  %522 = vmatprep.subr.bf16.mxu1 %v1626_v30  ;;  %v2073_v14 = vsub.s32 1, %v162_v13  ;;  %v2075_v15 = vsub.s32 0, %v162_v13 }
  0x73   :  { %v168_v18 = vrot.slane %v159_v16, %v2073_v14  ;;  %v164_v19 = vrot.slane %v159_v16, %v2075_v15 }
  0x74   :  { %272 = vmatpush1.bf16.msra.mxu0 %v1606_v25  ;;  %523 = vmatpush1.bf16.msra.mxu1 %v1628_v31 }
  0x75   :  { %524 = vmatprep.subr.bf16.mxu1 %v1629_v32  ;;  %763 = vmatprep.subr.bf16.mxu0 %v1658_v51  ;;  %v1724_v51 = vld [vmem:[#allocation10 + $0x14] ss:$8 sps:$4 sm:$0xff]  }
  0x77   :  { %290 = vmatmul.mubr.bf16.vlgmr.msra.gmra.mxu0 %v1607_v27 }
  0x78   :  { %525 = vmatpush1.bf16.msra.mxu1 %v1631_v33  ;;  %764 = vmatpush1.bf16.msra.mxu0 %v1656_v50  ;;  %v1697_v33 = vld [vmem:[#allocation8 + $0xa4] ss:$8 sps:$4 sm:$0xff]   ;;  %v1719_v50 = vld [vmem:[#allocation10 + $0x20] ss:$8 sps:$4 sm:$0xff]  }
  0x79   :  { %526 = vmatprep.subr.bf16.mxu1 %v1632_v34  ;;  %765 = vmatprep.subr.bf16.mxu0 %v1661_v52  ;;  %v1695_v34 = vld [vmem:[#allocation8 + $0xa0] ss:$8 sps:$4 sm:$0xff]   ;;  %v1722_v52 = vld [vmem:[#allocation10 + $0x10] ss:$8 sps:$4 sm:$0xff]  }
  0x7c   :  { %527 = vmatpush2.bf16.msra.mxu1 %v1634_v35  ;;  %766 = vmatpush1.bf16.msra.mxu0 %v1659_v53  ;;  %v1700_v35 = vld [vmem:[#allocation8 + $0x94] ss:$8 sps:$4 sm:$0xff]   ;;  %v1727_v53 = vld [vmem:[#allocation10 + $0x4] ss:$8 sps:$4 sm:$0xff]  }
  0x7d   :  { %528 = vmatprep.subr.bf16.mxu1 %v1635_v36  ;;  %767 = vmatprep.subr.bf16.mxu0 %v1664_v54  ;;  %v1698_v36 = vld [vmem:[#allocation8 + $0x90] ss:$8 sps:$4 sm:$0xff]   ;;  %v1725_v54 = vld [vmem:[#allocation10] ss:$8 sps:$4 sm:$0xff]  }
  0x80   :  { %529 = vmatpush2.bf16.msra.mxu1 %v1637_v37  ;;  %768 = vmatpush1.bf16.msra.mxu0 %v1662_v55  ;;  %v1703_v37 = vld [vmem:[#allocation8 + $0x84] ss:$8 sps:$4 sm:$0xff]   ;;  %v1730_v55 = vld [vmem:[#allocation10 + $0xf4] ss:$8 sps:$4 sm:$0xff]  }
  0x81   :  { %530 = vmatprep.subr.bf16.mxu1 %v1638_v38  ;;  %769 = vmatprep.subr.bf16.mxu0 %v1667_v56  ;;  %v1701_v38 = vld [vmem:[#allocation8 + $0x80] ss:$8 sps:$4 sm:$0xff]   ;;  %v1728_v56 = vld [vmem:[#allocation10 + $0xf0] ss:$8 sps:$4 sm:$0xff]  }
  0x84   :  { %531 = vmatpush2.bf16.msra.mxu1 %v1640_v39  ;;  %770 = vmatpush1.bf16.msra.mxu0 %v1665_v57  ;;  %v1704_v39 = vld [vmem:[#allocation10 + $0x70] ss:$8 sps:$4 sm:$0xff]   ;;  %v1733_v57 = vld [vmem:[#allocation10 + $0xe4] ss:$8 sps:$4 sm:$0xff]  }
  0x85   :  { %532 = vmatprep.subr.bf16.mxu1 %v1641_v40  ;;  %771 = vmatprep.subr.bf16.mxu0 %v1670_v58  ;;  %v1706_v40 = vld [vmem:[#allocation10 + $0x74] ss:$8 sps:$4 sm:$0xff]   ;;  %v1731_v58 = vld [vmem:[#allocation10 + $0xe0] ss:$8 sps:$4 sm:$0xff]  }
  0x88   :  { %533 = vmatpush2.bf16.msra.mxu1 %v1643_v41  ;;  %772 = vmatpush1.bf16.msra.mxu0 %v1668_v59  ;;  %v1709_v41 = vld [vmem:[#allocation10 + $0x64] ss:$8 sps:$4 sm:$0xff]   ;;  %v1736_v59 = vld [vmem:[#allocation10 + $0xd4] ss:$8 sps:$4 sm:$0xff]  }
  0x89   :  { %534 = vmatprep.subr.bf16.mxu1 %v1644_v42  ;;  %773 = vmatprep.subr.bf16.mxu0 %v1673_v60  ;;  %v1707_v42 = vld [vmem:[#allocation10 + $0x60] ss:$8 sps:$4 sm:$0xff]   ;;  %v1734_v60 = vld [vmem:[#allocation10 + $0xd0] ss:$8 sps:$4 sm:$0xff]  }
  0x8c   :  { %535 = vmatpush2.bf16.msra.mxu1 %v1646_v43  ;;  %774 = vmatpush1.bf16.msra.mxu0 %v1671_v61  ;;  %v1712_v43 = vld [vmem:[#allocation10 + $0x54] ss:$8 sps:$4 sm:$0xff]   ;;  %v1739_v61 = vld [vmem:[#allocation10 + $0xc4] ss:$8 sps:$4 sm:$0xff]  }
  0x8d   :  { %536 = vmatprep.subr.bf16.mxu1 %v1647_v44  ;;  %775 = vmatprep.subr.bf16.mxu0 %v1676_v62  ;;  %v1710_v44 = vld [vmem:[#allocation10 + $0x50] ss:$8 sps:$4 sm:$0xff]   ;;  %v1737_v62 = vld [vmem:[#allocation10 + $0xc0] ss:$8 sps:$4 sm:$0xff]  }
  0x90   :  { %537 = vmatpush2.bf16.msra.mxu1 %v1649_v45  ;;  %776 = vmatpush1.bf16.msra.mxu0 %v1674_v63  ;;  %v1715_v45 = vld [vmem:[#allocation10 + $0x44] ss:$8 sps:$4 sm:$0xff]   ;;  %v1742_v63 = vld [vmem:[#allocation10 + $0xb4] ss:$8 sps:$4 sm:$0xff]  }
  0x91   :  { %538 = vmatprep.subr.bf16.mxu1 %v1650_v46  ;;  %777 = vmatprep.subr.bf16.mxu0 %v1679_v0  ;;  %v1713_v46 = vld [vmem:[#allocation10 + $0x40] ss:$8 sps:$4 sm:$0xff]   ;;  %v1740_v0 = vld [vmem:[#allocation10 + $0xb0] ss:$8 sps:$4 sm:$0xff]  }
  0x94   :  { %539 = vmatpush2.bf16.msra.mxu1 %v1652_v47  ;;  %778 = vmatpush1.bf16.msra.mxu0 %v1677_v1  ;;  %v1718_v47 = vld [vmem:[#allocation10 + $0x34] ss:$8 sps:$4 sm:$0xff]   ;;  %v338_v1 = vld [vmem:[%s2113_s4] sm:$0x3] }
  0x95   :  { %540 = vmatprep.subr.bf16.mxu1 %v1653_v48  ;;  %779 = vmatprep.subr.bf16.mxu0 %v1682_v2  ;;  %v1716_v48 = vld [vmem:[#allocation10 + $0x30] ss:$8 sps:$4 sm:$0xff]  }
  0x98   :  { %541 = vmatpush2.bf16.msra.mxu1 %v1655_v49  ;;  %780 = vmatpush2.bf16.msra.mxu0 %v1680_v3  ;;  %v1721_v49 = vld [vmem:[#allocation10 + $0x24] ss:$8 sps:$4 sm:$0xff]   ;;  %v347_v3 = vrot.slane %v338_v1, %v2073_v14 }
  0x99   :  { %781 = vmatprep.subr.bf16.mxu0 %v1685_v4  ;;  %1016 = vmatprep.subr.bf16.mxu1 %v1706_v40  ;;  %v343_v4 = vrot.slane %v338_v1, %v2075_v15 }
  0x9c   :  { %782 = vmatpush2.bf16.msra.mxu0 %v1683_v5 }
  0x9d   :  { %783 = vmatprep.subr.bf16.mxu0 %v1688_v6 }
  0xa0   :  { %784 = vmatpush2.bf16.msra.mxu0 %v1686_v7 }
  0xa1   :  { %785 = vmatprep.subr.bf16.mxu0 %v1691_v8 }
  0xa4   :  { %786 = vmatpush2.bf16.msra.mxu0 %v1689_v9 }
  0xa5   :  { %787 = vmatprep.subr.bf16.mxu0 %v1694_v10 }
  0xa8   :  { %788 = vmatpush2.bf16.msra.mxu0 %v1692_v11 }
  0xa9   :  { %789 = vmatprep.subr.bf16.mxu0 %v1697_v33  ;;  %v1759_v33 = vld [vmem:[#allocation11 + $0x20] sm:$0xff]  }
  0xac   :  { %790 = vmatpush2.bf16.msra.mxu0 %v1695_v34  ;;  %v1760_v34 = vld [vmem:[#allocation11 + $0x58] sm:$0xff]  }
  0xad   :  { %791 = vmatprep.subr.bf16.mxu0 %v1700_v35  ;;  %v1761_v35 = vld [vmem:[#allocation11 + $0x18] sm:$0xff]  }
  0xb0   :  { %792 = vmatpush2.bf16.msra.mxu0 %v1698_v36  ;;  %v591_v36 = vld [vmem:[%s2115_s6] sm:$0x3] }
  0xb1   :  { %793 = vmatprep.subr.bf16.mxu0 %v1703_v37 }
  0xb4   :  { %794 = vmatpush2.bf16.msra.mxu0 %v1701_v38  ;;  %v600_v38 = vrot.slane %v591_v36, %v2073_v14 }
 0x137   :  { %v291_v17 = vpop.f32.mrf.mxu0 }
 0x138   :  { %v292_v24 = vadd.f32 %v291_v17, %v164_v19 }
 0x139   :  { %v293_v20 = vpop.f32.mrf.mxu0 }
 0x13a   :  { %v294_v22 = vadd.f32 %v293_v20, %v168_v18  ;;  %v300_v30 = vmax.f32 %v292_v24, 0.0  ;;  %v1745_v20 = vld [vmem:[#allocation10 + $0xa4] ss:$8 sps:$4 sm:$0xff]  }
 0x13b   :  { %v295_v21 = vpop.f32.mrf.mxu0  ;;  %v1751_v24 = vld [vmem:[#allocation10 + $0x84] ss:$8 sps:$4 sm:$0xff]  }
 0x13c   :  { %v296_v23 = vadd.f32 %v295_v21, %v164_v19  ;;  %v301_v28 = vmax.f32 %v294_v22, 0.0  ;;  %v1743_v21 = vld [vmem:[#allocation10 + $0xa0] ss:$8 sps:$4 sm:$0xff]   ;;  %v1748_v22 = vld [vmem:[#allocation10 + $0x94] ss:$8 sps:$4 sm:$0xff]  }
 0x13d   :  { %v297_v25 = vpop.f32.mrf.mxu0 }
 0x13e   :  { %v298_v26 = vadd.f32 %v297_v25, %v168_v18  ;;  %v302_v27 = vmax.f32 %v296_v23, 0.0  ;;  %v1746_v23 = vld [vmem:[#allocation10 + $0x90] ss:$8 sps:$4 sm:$0xff]   ;;  %v1749_v25 = vld [vmem:[#allocation10 + $0x80] ss:$8 sps:$4 sm:$0xff]  }
 0x140   :  { %v303_v29 = vmax.f32 %v298_v26, 0.0  ;;  %v304_v32 = vpack.c.bf16 %v302_v27, %v300_v30  ;;  %v1752_v26 = vld [vmem:[#allocation11 + $0x78] sm:$0xff]   ;;  %v1756_v30 = vld [vmem:[#allocation11 + $0x68] sm:$0xff]  }
 0x141   :  { %v1753_v27 = vld [vmem:[#allocation11 + $0x38] sm:$0xff]   ;;  %1517 = vmatprep.subr.bf16.mxu0 %v1752_v26 }
 0x142   :  { %v305_v31 = vpack.c.bf16 %v303_v29, %v301_v28  ;;  %v1754_v28 = vld [vmem:[#allocation11 + $0x70] sm:$0xff]  }
 0x143   :  { %v1755_v29 = vld [vmem:[#allocation11 + $0x30] sm:$0xff]  }
 0x144   :  { %542 = vmatprep.mubr.bf16.mxu1 %v305_v31  ;;  %v1757_v31 = vld [vmem:[#allocation11 + $0x28] sm:$0xff]  }
 0x145   :  { %543 = vmatmul.mubr.bf16.vlgmr.msra.gmra.mxu1 %v304_v32  ;;  %v1758_v32 = vld [vmem:[#allocation11 + $0x60] sm:$0xff]  }
 0x146   :  { %1017 = vmatpush1.bf16.msra.mxu1 %v1704_v39  ;;  %v596_v39 = vrot.slane %v591_v36, %v2075_v15 }
 0x147   :  { %1018 = vmatprep.subr.bf16.mxu1 %v1709_v41 }
 0x14a   :  { %1019 = vmatpush1.bf16.msra.mxu1 %v1707_v42 }
 0x14b   :  { %1020 = vmatprep.subr.bf16.mxu1 %v1712_v43 }
 0x14e   :  { %1021 = vmatpush1.bf16.msra.mxu1 %v1710_v44 }
 0x14f   :  { %1022 = vmatprep.subr.bf16.mxu1 %v1715_v45 }
 0x152   :  { %1023 = vmatpush1.bf16.msra.mxu1 %v1713_v46 }
 0x153   :  { %1024 = vmatprep.subr.bf16.mxu1 %v1718_v47 }
 0x156   :  { %1025 = vmatpush1.bf16.msra.mxu1 %v1716_v48 }
 0x157   :  { %1026 = vmatprep.subr.bf16.mxu1 %v1721_v49 }
 0x15a   :  { %1027 = vmatpush1.bf16.msra.mxu1 %v1719_v50 }
 0x15b   :  { %1028 = vmatprep.subr.bf16.mxu1 %v1724_v51 }
 0x15e   :  { %1029 = vmatpush1.bf16.msra.mxu1 %v1722_v52 }
 0x15f   :  { %1030 = vmatprep.subr.bf16.mxu1 %v1727_v53  ;;  %v1762_v53 = vld [vmem:[#allocation11 + $0x50] sm:$0xff]  }
 0x162   :  { %1031 = vmatpush1.bf16.msra.mxu1 %v1725_v54  ;;  %v1763_v54 = vld [vmem:[#allocation11 + $0x10] sm:$0xff]  }
 0x163   :  { %1032 = vmatprep.subr.bf16.mxu1 %v1730_v55  ;;  %v1764_v55 = vld [vmem:[#allocation11 + $0x48] sm:$0xff]  }
 0x166   :  { %1033 = vmatpush2.bf16.msra.mxu1 %v1728_v56  ;;  %v1765_v56 = vld [vmem:[#allocation11 + $0x8] sm:$0xff]  }
 0x167   :  { %1034 = vmatprep.subr.bf16.mxu1 %v1733_v57  ;;  %v1766_v57 = vld [vmem:[#allocation11 + $0x40] sm:$0xff]  }
 0x16a   :  { %1035 = vmatpush2.bf16.msra.mxu1 %v1731_v58  ;;  %v1767_v58 = vld [vmem:[#allocation11] sm:$0xff]  }
 0x16b   :  { %1036 = vmatprep.subr.bf16.mxu1 %v1736_v59  ;;  %v1958_v59 = vmov 0.0  }
 0x16e   :  { %1037 = vmatpush2.bf16.msra.mxu1 %v1734_v60  ;;  %v844_v60 = vld [vmem:[%s2117_s8] sm:$0x3] }
 0x16f   :  { %1038 = vmatprep.subr.bf16.mxu1 %v1739_v61 }
 0x172   :  { %1039 = vmatpush2.bf16.msra.mxu1 %v1737_v62  ;;  %v853_v62 = vrot.slane %v844_v60, %v2073_v14  ;;  %v1769_v14 = vld [vmem:[#allocation13 + $0x30] sm:$0xff]  }
 0x173   :  { %1040 = vmatprep.subr.bf16.mxu1 %v1742_v63  ;;  %v849_v63 = vrot.slane %v844_v60, %v2075_v15  ;;  %v1770_v15 = vld [vmem:[#allocation13 + $0x28] sm:$0xff]  }
 0x176   :  { %1041 = vmatpush2.bf16.msra.mxu1 %v1740_v0 }
 0x177   :  { %1042 = vmatprep.subr.bf16.mxu1 %v1745_v20  ;;  %v1775_v20 = vld [vmem:[#allocation13] sm:$0xff]  }
 0x17a   :  { %1043 = vmatpush2.bf16.msra.mxu1 %v1743_v21 }
 0x17b   :  { %1044 = vmatprep.subr.bf16.mxu1 %v1748_v22 }
 0x17e   :  { %1045 = vmatpush2.bf16.msra.mxu1 %v1746_v23 }
 0x17f   :  { %1046 = vmatprep.subr.bf16.mxu1 %v1751_v24  ;;  %v1491_v24 = vld [vmem:[%s2119_s10] ss:$0 sm:$0xff]  ;;  %s1916_s10 = scalar_lea.vmem %s1364_s17, 256 }
 0x180   :  { %p1917_p7 = scmp.ne.s32.totalorder %s1364_s17, %s1916_s10  ;;  %p1922_p9 = scmp.lt.s32.totalorder %s1916_s10, %s1916_s10 }
 0x182   :  { %1047 = vmatpush2.bf16.msra.mxu1 %v1749_v25  ;;  %p1923_p10 = por %p1922_p9, %p1921_p8 }
 0x184   :  { %p1924_p11 = pnand %p1923_p10, %p1917_p7 }
 0x205   :  { %v544_v2 = vpop.f32.mrf.mxu1 }
 0x206   :  { %v545_v9 = vadd.f32 %v544_v2, %v343_v4 }
 0x207   :  { %v546_v5 = vpop.f32.mrf.mxu1 }
 0x208   :  { %v547_v7 = vadd.f32 %v546_v5, %v347_v3  ;;  %v553_v17 = vmax.f32 %v545_v9, 0.0 }
 0x209   :  { %v548_v6 = vpop.f32.mrf.mxu1 }
 0x20a   :  { %v549_v8 = vadd.f32 %v548_v6, %v343_v4  ;;  %v554_v13 = vmax.f32 %v547_v7, 0.0 }
 0x20b   :  { %v550_v10 = vpop.f32.mrf.mxu1 }
 0x20c   :  { %v551_v11 = vadd.f32 %v550_v10, %v347_v3  ;;  %v555_v12 = vmax.f32 %v549_v8, 0.0 }
 0x20e   :  { %v556_v16 = vmax.f32 %v551_v11, 0.0  ;;  %v557_v19 = vpack.c.bf16 %v555_v12, %v553_v17  ;;  %v1768_v12 = vld [vmem:[#allocation13 + $0x38] sm:$0xff]  }
 0x20f   :  { %v1772_v17 = vld [vmem:[#allocation13 + $0x18] sm:$0xff]  }
 0x210   :  { %v558_v18 = vpack.c.bf16 %v556_v16, %v554_v13  ;;  %v1771_v16 = vld [vmem:[#allocation13 + $0x20] sm:$0xff]  }
 0x212   :  { %795 = vmatprep.mubr.bf16.mxu0 %v558_v18  ;;  %v1773_v18 = vld [vmem:[#allocation13 + $0x10] sm:$0xff]  }
 0x213   :  { %796 = vmatmul.mubr.bf16.vlgmr.msra.gmra.mxu0 %v557_v19  ;;  %v1774_v19 = vld [vmem:[#allocation13 + $0x8] sm:$0xff]  }
 0x214   :  { %1518 = vmatpush3.bf16.msra.mxu0 %v1753_v27 }
 0x215   :  { %1519 = vmatprep.subr.bf16.mxu0 %v1754_v28 }
 0x218   :  { %1520 = vmatpush3.bf16.msra.mxu0 %v1755_v29 }
 0x219   :  { %1521 = vmatprep.subr.bf16.mxu0 %v1756_v30 }
 0x21c   :  { %1522 = vmatpush3.bf16.msra.mxu0 %v1757_v31 }
 0x21d   :  { %1523 = vmatprep.subr.bf16.mxu0 %v1758_v32 }
 0x220   :  { %1524 = vmatpush3.bf16.msra.mxu0 %v1759_v33  ;;  %v1508_v33 = vld [vmem:[%s2121_s12] ss:$0 sm:$0xff] }
 0x221   :  { %1525 = vmatprep.subr.bf16.mxu0 %v1760_v34 }
 0x224   :  { %1526 = vmatpush3.bf16.msra.mxu0 %v1761_v35 }
 0x225   :  { %1527 = vmatprep.subr.bf16.mxu0 %v1762_v53 }
 0x228   :  { %1528 = vmatpush3.bf16.msra.mxu0 %v1763_v54 }
 0x229   :  { %1529 = vmatprep.subr.bf16.mxu0 %v1764_v55 }
 0x22c   :  { %1530 = vmatpush3.bf16.msra.mxu0 %v1765_v56 }
 0x22d   :  { %1531 = vmatprep.subr.bf16.mxu0 %v1766_v57 }
 0x230   :  { %1532 = vmatpush3.bf16.msra.mxu0 %v1767_v58 }
 0x231   :  { %1548 = vmatprep.subr.bf16.mxu0 %v1958_v59 }
 0x2d3   :  { %v797_v37 = vpop.f32.mrf.mxu0 }
 0x2d4   :  { %v798_v44 = vadd.f32 %v797_v37, %v596_v39 }
 0x2d5   :  { %v799_v40 = vpop.f32.mrf.mxu0 }
 0x2d6   :  { %v800_v42 = vadd.f32 %v799_v40, %v600_v38  ;;  %v806_v50 = vmax.f32 %v798_v44, 0.0 }
 0x2d7   :  { %v801_v41 = vpop.f32.mrf.mxu0 }
 0x2d8   :  { %v802_v43 = vadd.f32 %v801_v41, %v596_v39  ;;  %v807_v48 = vmax.f32 %v800_v42, 0.0 }
 0x2d9   :  { %v803_v45 = vpop.f32.mrf.mxu0 }
 0x2da   :  { %v804_v46 = vadd.f32 %v803_v45, %v600_v38  ;;  %v808_v47 = vmax.f32 %v802_v43, 0.0 }
 0x2dc   :  { %v809_v49 = vmax.f32 %v804_v46, 0.0  ;;  %v810_v52 = vpack.c.bf16 %v808_v47, %v806_v50 }
 0x2de   :  { %v811_v51 = vpack.c.bf16 %v809_v49, %v807_v48 }
 0x2e0   :  { %1048 = vmatprep.mubr.bf16.mxu1 %v811_v51 }
 0x2e1   :  { %1049 = vmatmul.mubr.bf16.vlgmr.msra.gmra.mxu1 %v810_v52 }
 0x3a1   :  { %v1050_v61 = vpop.f32.mrf.mxu1 }
 0x3a2   :  { %v1051_v4 = vadd.f32 %v1050_v61, %v849_v63 }
 0x3a3   :  { %v1052_v0 = vpop.f32.mrf.mxu1 }
 0x3a4   :  { %v1053_v2 = vadd.f32 %v1052_v0, %v853_v62  ;;  %v1059_v10 = vmax.f32 %v1051_v4, 0.0 }
 0x3a5   :  { %v1054_v1 = vpop.f32.mrf.mxu1 }
 0x3a6   :  { %v1055_v3 = vadd.f32 %v1054_v1, %v849_v63  ;;  %v1060_v8 = vmax.f32 %v1053_v2, 0.0 }
 0x3a7   :  { %v1056_v5 = vpop.f32.mrf.mxu1 }
 0x3a8   :  { %v1057_v6 = vadd.f32 %v1056_v5, %v853_v62  ;;  %v1061_v7 = vmax.f32 %v1055_v3, 0.0 }
 0x3aa   :  { %v1062_v9 = vmax.f32 %v1057_v6, 0.0  ;;  %v1063_v13 = vpack.c.bf16 %v1061_v7, %v1059_v10 }
 0x3ac   :  { %v1064_v11 = vpack.c.bf16 %v1062_v9, %v1060_v8 }
 0x3ae   :  { %1232 = vmatprep.mubr.bf16.mxu0 %v1064_v11 }
 0x3af   :  { %1233 = vmatmul.mubr.bf16.vlgmr.msra.gmra.mxu0 %v1063_v13 }
 0x3b0   :  { %1549 = vmatpush3.bf16.msra.mxu0 %v1768_v12  ;;  %1564 = vmatprep.mubr.msk.bf16.mxu0 %vm1959_vm0, %v1958_v59 }
 0x3b1   :  { %1550 = vmatprep.subr.bf16.mxu0 %v1958_v59 }
 0x3b4   :  { %1551 = vmatpush3.bf16.msra.mxu0 %v1769_v14 }
 0x3b5   :  { %1552 = vmatprep.subr.bf16.mxu0 %v1958_v59 }
 0x3b8   :  { %1553 = vmatpush3.bf16.msra.mxu0 %v1770_v15 }
 0x3b9   :  { %1554 = vmatprep.subr.bf16.mxu0 %v1958_v59 }
 0x3bc   :  { %1555 = vmatpush3.bf16.msra.mxu0 %v1771_v16 }
 0x3bd   :  { %1556 = vmatprep.subr.bf16.mxu0 %v1958_v59 }
 0x3c0   :  { %1557 = vmatpush3.bf16.msra.mxu0 %v1772_v17 }
 0x3c1   :  { %1558 = vmatprep.subr.bf16.mxu0 %v1958_v59 }
 0x3c4   :  { %1559 = vmatpush3.bf16.msra.mxu0 %v1773_v18 }
 0x3c5   :  { %1560 = vmatprep.subr.bf16.mxu0 %v1958_v59 }
 0x3c8   :  { %1561 = vmatpush3.bf16.msra.mxu0 %v1774_v19 }
 0x3c9   :  { %1562 = vmatprep.subr.bf16.mxu0 %v1958_v59 }
 0x3cc   :  { %1563 = vmatpush3.bf16.msra.mxu0 %v1775_v20 }
 0x46f   :  { %v1533_v21 = vpop.f32.mrf.mxu0 }
 0x471   :  { %v1534_v22 = vpop.f32.mrf.mxu0 }
 0x472   :  { %v1535_v23 = vadd.f32 %v1534_v22, %v1533_v21 }
 0x473   :  { %v1536_v25 = vpop.f32.mrf.mxu0 }
 0x474   :  { %v1235_v27 = vadd.f32 %v1535_v23, %v1491_v24 }
 0x475   :  { %v1537_v26 = vpop.f32.mrf.mxu0 }
 0x476   :  { %v1538_v28 = vadd.f32 %v1537_v26, %v1536_v25  ;;  %v1241_v30 = vmax.f32 %v1235_v27, 0.0 }
 0x478   :  { %v1238_v29 = vadd.f32 %v1538_v28, %v1491_v24 }
 0x47a   :  { %v1242_v31 = vmax.f32 %v1238_v29, 0.0 }
 0x47c   :  { %v1243_v32 = vpack.c.bf16 %v1242_v31, %v1241_v30 }
 0x47e   :  { %1565 = vmatmul.mubr.bf16.vlgmr.msra.gmra.mxu0 %v1243_v32 }
 0x53e   :  { %v1349_v34 = vpop.f32.mrf.mxu0 }
 0x53f   :  { %v1350_v35 = vadd.f32 %v1508_v33, %v1349_v34 }
 0x540   :  { %v1566_v36 = vpop.f32.mrf.mxu0 }
 0x541   :  { %1356 = vst [vmem:[#allocation14] sm:$0xff] %v1350_v35 }
 0x542   :  { %v1352_v37 = vpop.f32.mrf.mxu0 }
 0x543   :  { %v1353_v38 = vadd.f32 %v1508_v33, %v1352_v37 }
 0x544   :  { %v1567_v39 = vpop.f32.mrf.mxu0 }
 0x545   :  { %1357 = vst [vmem:[#allocation14 + $0x8] sm:$0xff] %v1353_v38 }
 0x546   :  { %1927 = shalt.err (!%p1924_p11)
}
 0x547   :  { %1369 = dma.vmem_to_hbm [thread:$0]  %s1364_s17, 256, %s2122_s13, [#allocation4], %s1947_s28, %s1947_s28, %s1948_s29  }
 0x548   :  { %1944 = dma.done.wait [#allocation4], 256  }
 0x549   :  { %1945 = vsyncadd [#allocation4], 4294967040 }
 0x54a   :  { %1373 = vsyncpa [#allocation3], 1 }
 0x54b   :  { %1374 = vsyncpa [#allocation6], 1 }
 0x54c   :  { %1375 = vsyncpa [#allocation9], 1 }
 0x54d   :  { %1376 = vsyncpa [#allocation12], 1 }
 0x54e   :  { %1377 = vsyncpa [#allocation4], 1 }

</bundles_post_ra>
